<compile_context>
chip_gen: v7x
topology: tpu7x:2x2x1
jax: 0.10.0
libtpu: 0.0.40
codegen_flags: <defaults>
</compile_context>

<pallas_src>
import functools

import jax
import jax.numpy as jnp
from jax import lax
from jax.experimental import pallas as pl
from jax.experimental.pallas import tpu as pltpu


def _temporal_block_kernel(x_ref, w_ref, b_ref, ln_w_ref, ln_b_ref, o_ref, *,
                           c_out, residual_row0, negative_slope, eps,
                           use_downsample):
    """One batch block per grid step.

    x_ref    : (B_blk, K*C_in, L)  im2col-staged, causally padded input
    w_ref    : (CT, K*C_in)        stacked conv (+ fused downsample) weights
    b_ref    : (CT, 1)             stacked conv (+ downsample) bias
    ln_w_ref : (1, L)              LayerNorm gamma
    ln_b_ref : (1, L)              LayerNorm beta
    o_ref    : (B_blk, C_out, L)
    """
    bb, kc, l = x_ref.shape
    ct = w_ref.shape[0]

    xb = x_ref[...].astype(jnp.float32)                       # (B, KC, L)
    w32 = w_ref[...].astype(jnp.float32)                      # (CT, KC)
    wb = jnp.broadcast_to(w32[None], (bb, ct, kc))            # hoisted, once/step

    # Single batched im2col contraction (conv taps + fused 1x1 downsample),
    # default MXU precision, f32 accumulation.
    y = jnp.einsum('bok,bkl->bol', wb, xb,
                   preferred_element_type=jnp.float32)        # (B, CT, L)
    y = y + b_ref[...].astype(jnp.float32)[None]              # (CT,1) broadcast

    conv = y[:, :c_out, :]                                    # (B, C_out, L)
    if use_downsample:
        res = y[:, c_out:, :]                                 # fused 1x1 conv
    else:
        # Identity residual == last-tap block of the im2col input (offset 0).
        res = xb[:, residual_row0:, :]                        # (B, C_in==C_out, L)

    # LeakyReLU
    a = jnp.where(conv > 0, conv, negative_slope * conv)

    # LayerNorm over the temporal (lane) axis, single-pass statistics.
    inv_l = 1.0 / l
    s = jnp.sum(a, axis=-1, keepdims=True)
    ss = jnp.sum(a * a, axis=-1, keepdims=True)
    mean = s * inv_l
    var = ss * inv_l - mean * mean
    a = (a - mean) * lax.rsqrt(var + eps)
    a = (a * ln_w_ref[...].astype(jnp.float32)[None]
         + ln_b_ref[...].astype(jnp.float32)[None])

    # Residual add + final ReLU.
    o_ref[...] = jnp.maximum(a + res, 0.0).astype(o_ref.dtype)


def temporal_block(x, conv_v, conv_g, conv_b, ln_w, ln_b,
                   ds_w=None, ds_b=None, *,
                   stride=1, dilation=1, padding=0,
                   negative_slope=0.01, eps=1e-5, batch_block=None):
    """Fused TemporalBlock forward.  x: (N, C_in, L) -> (N, C_out, L)."""
    N, C_in, L = x.shape
    C_out, C_in_w, K = conv_v.shape
    assert C_in_w == C_in
    # TODO(synk): stride != 1 has no clean equivalent here — the PyTorch
    # module's residual add only shape-checks for stride == 1 and
    # padding == dilation * (kernel_size - 1), so we require that config.
    assert stride == 1
    assert padding == dilation * (K - 1)
    L_out = L + padding - dilation * (K - 1)                  # == L
    assert ln_w.shape[-1] == L_out and ln_b.shape[-1] == L_out

    # weight_norm (dim=0): w = g * v / ||v||, norm over (in_ch, tap) per out ch.
    v32 = conv_v.astype(jnp.float32)
    v_norm = jnp.sqrt(jnp.sum(v32 * v32, axis=(1, 2), keepdims=True))
    w_eff = jnp.reshape(conv_g, (C_out, 1, 1)).astype(jnp.float32) * v32 / v_norm

    # im2col weights: row index k*C_in + c  <->  tap k, input channel c.
    w_im2col = jnp.reshape(jnp.transpose(w_eff, (0, 2, 1)), (C_out, K * C_in))

    use_downsample = ds_w is not None
    if use_downsample:
        # Fuse the 1x1 downsample as C_out extra output rows acting only on the
        # last tap block (== un-shifted x).
        wds = jnp.reshape(ds_w, (C_out, C_in)).astype(jnp.float32)
        ds_rows = jnp.concatenate(
            [jnp.zeros((C_out, (K - 1) * C_in), jnp.float32), wds], axis=1)
        w_full = jnp.concatenate([w_im2col, ds_rows], axis=0)   # (2*C_out, K*C_in)
        b_full = jnp.concatenate([conv_b.astype(jnp.float32),
                                  ds_b.astype(jnp.float32)])
    else:
        assert C_in == C_out
        w_full = w_im2col
        b_full = conv_b.astype(jnp.float32)
    CT = w_full.shape[0]
    KC = K * C_in

    # im2col staging of x with the causal left pad folded in (conv+chomp ==
    # left-pad-only causal conv).  XLA fuses pad + slices + concat; no padded
    # copy of x survives in HBM besides this single staging tensor.
    x_pad = jnp.pad(x, ((0, 0), (0, 0), (padding, 0)))
    x_col = jnp.concatenate(
        [x_pad[:, :, k * dilation:k * dilation + L_out] for k in range(K)],
        axis=1)                                                # (N, K*C_in, L)

    # Batch tiling: amortize per-grid-step overhead; keep >= 2 parallel grid
    # steps whenever N >= 2 so v7x's two TensorCores both get work.
    if batch_block is None:
        batch_block = max(1, min(128, pl.cdiv(N, 2)))
    n_blocks = pl.cdiv(N, batch_block)
    N_pad = n_blocks * batch_block
    if N_pad != N:
        x_col = jnp.pad(x_col, ((0, N_pad - N), (0, 0), (0, 0)))

    kernel = functools.partial(
        _temporal_block_kernel,
        c_out=C_out, residual_row0=(K - 1) * C_in,
        negative_slope=negative_slope, eps=eps,
        use_downsample=use_downsample)

    out = pl.pallas_call(
        kernel,
        out_shape=jax.ShapeDtypeStruct((N_pad, C_out, L_out), x.dtype),
        grid_spec=pltpu.PrefetchScalarGridSpec(
            num_scalar_prefetch=0,
            grid=(n_blocks,),
            in_specs=[
                pl.BlockSpec((batch_block, KC, L_out), lambda b: (b, 0, 0)),
                pl.BlockSpec((CT, KC), lambda b: (0, 0)),
                pl.BlockSpec((CT, 1), lambda b: (0, 0)),
                pl.BlockSpec((1, L_out), lambda b: (0, 0)),
                pl.BlockSpec((1, L_out), lambda b: (0, 0)),
            ],
            out_specs=pl.BlockSpec((batch_block, C_out, L_out),
                                   lambda b: (b, 0, 0)),
        ),
        compiler_params=pltpu.CompilerParams(
            dimension_semantics=("parallel",)),
    )(x_col.astype(x.dtype),
      w_full,
      jnp.reshape(b_full, (CT, 1)),
      jnp.reshape(ln_w, (1, L_out)).astype(jnp.float32),
      jnp.reshape(ln_b, (1, L_out)).astype(jnp.float32))

    return out[:N] if N_pad != N else out


def temporal_block_ref(x, conv_v, conv_g, conv_b, ln_w, ln_b, ds_w, ds_b,
                       *, dilation, padding, negative_slope=0.01, eps=1e-5):
    """Pure-JAX reference mirroring the PyTorch module step by step (full f32)."""
    C_out = conv_v.shape[0]
    v32 = conv_v.astype(jnp.float32)
    v_norm = jnp.sqrt(jnp.sum(v32 * v32, axis=(1, 2), keepdims=True))
    w_eff = jnp.reshape(conv_g, (C_out, 1, 1)) * v32 / v_norm
    dn = ('NCH', 'OIH', 'NCH')
    y = lax.conv_general_dilated(x, w_eff, window_strides=(1,),
                                 padding=[(padding, padding)],
                                 rhs_dilation=(dilation,),
                                 dimension_numbers=dn,
                                 precision=lax.Precision.HIGHEST)
    y = y + conv_b[None, :, None]
    y = y[:, :, :y.shape[-1] - padding]                       # Chomp1d
    y = jnp.where(y > 0, y, negative_slope * y)               # LeakyReLU
    mean = y.mean(-1, keepdims=True)
    var = ((y - mean) ** 2).mean(-1, keepdims=True)
    y = (y - mean) / jnp.sqrt(var + eps) * ln_w + ln_b        # LayerNorm(L)
    if ds_w is not None:
        res = lax.conv_general_dilated(x, ds_w, window_strides=(1,),
                                       padding=[(0, 0)],
                                       dimension_numbers=dn,
                                       precision=lax.Precision.HIGHEST)
        res = res + ds_b[None, :, None]
    else:
        res = x
    return jnp.maximum(y + res, 0.0)


if __name__ == "__main__":
    key = jax.random.PRNGKey(0)

    # Shapes consistent with the module: LayerNorm(30) pins L = 30.
    K, stride, dilation = 3, 1, 2
    padding = (K - 1) * dilation          # causal TCN padding == chomp size
    L = 30

    # Case 1: n_inputs != n_outputs  ->  fused 1x1 downsample residual.
    N, C_in, C_out = 8, 8, 16
    ks = jax.random.split(key, 8)
    x      = jax.random.normal(ks[0], (N, C_in, L), jnp.float32)
    conv_v = jax.random.normal(ks[1], (C_out, C_in, K), jnp.float32) * 0.3
    conv_g = jax.random.normal(ks[2], (C_out,), jnp.float32) * 0.2 + 1.0
    conv_b = jax.random.normal(ks[3], (C_out,), jnp.float32) * 0.1
    ln_w   = jax.random.normal(ks[4], (L,), jnp.float32) * 0.1 + 1.0
    ln_b   = jax.random.normal(ks[5], (L,), jnp.float32) * 0.1
    ds_w   = jax.random.normal(ks[6], (C_out, C_in, 1), jnp.float32) * 0.3
    ds_b   = jax.random.normal(ks[7], (C_out,), jnp.float32) * 0.1

    out = temporal_block(x, conv_v, conv_g, conv_b, ln_w, ln_b, ds_w, ds_b,
                         stride=stride, dilation=dilation, padding=padding)
    out = jax.block_until_ready(out)
    ref = temporal_block_ref(x, conv_v, conv_g, conv_b, ln_w, ln_b, ds_w, ds_b,
                             dilation=dilation, padding=padding)
    assert out.shape == (N, C_out, L)
    assert out.dtype == x.dtype
    # Tolerance loosened vs. the f32-HIGHEST reference: the kernel now uses
    # default MXU precision (perf-review request).
    err1 = float(jnp.max(jnp.abs(out - ref)))
    assert jnp.allclose(out, ref, rtol=2e-2, atol=2e-2), err1

    # Case 2: n_inputs == n_outputs  ->  identity residual, no downsample.
    N2, C2 = 2, 16
    ks2 = jax.random.split(jax.random.PRNGKey(1), 6)
    x2      = jax.random.normal(ks2[0], (N2, C2, L), jnp.float32)
    conv_v2 = jax.random.normal(ks2[1], (C2, C2, K), jnp.float32) * 0.3
    conv_g2 = jax.random.normal(ks2[2], (C2,), jnp.float32) * 0.2 + 1.0
    conv_b2 = jax.random.normal(ks2[3], (C2,), jnp.float32) * 0.1
    ln_w2   = jax.random.normal(ks2[4], (L,), jnp.float32) * 0.1 + 1.0
    ln_b2   = jax.random.normal(ks2[5], (L,), jnp.float32) * 0.1

    out2 = temporal_block(x2, conv_v2, conv_g2, conv_b2, ln_w2, ln_b2,
                          None, None,
                          stride=stride, dilation=dilation, padding=padding)
    out2 = jax.block_until_ready(out2)
    ref2 = temporal_block_ref(x2, conv_v2, conv_g2, conv_b2, ln_w2, ln_b2,
                              None, None, dilation=dilation, padding=padding)
    assert out2.shape == (N2, C2, L)
    err2 = float(jnp.max(jnp.abs(out2 - ref2)))
    assert jnp.allclose(out2, ref2, rtol=2e-2, atol=2e-2), err2

    print("KERNEL_OK")
</pallas_src>

<mosaic_0001>
module attributes {stable_mosaic.version = 11 : i64} {
  func.func @_temporal_block_kernel(%arg0: i32, %arg1: memref<4x24x30xf32, #tpu.memory_space<vmem>>, %arg2: memref<32x24xf32, #tpu.memory_space<vmem>>, %arg3: memref<32x1xf32, #tpu.memory_space<vmem>>, %arg4: memref<1x30xf32, #tpu.memory_space<vmem>>, %arg5: memref<1x30xf32, #tpu.memory_space<vmem>>, %arg6: memref<4x16x30xf32, #tpu.memory_space<vmem>>) attributes {dimension_semantics = [#tpu.dimension_semantics<parallel>], iteration_bounds = array<i64: 2>, scalar_prefetch = 0 : i64, scratch_operands = 0 : i64, tpu.core_type = #tpu.core_type<tc>, window_params = [{transform_indices = @transform_0, window_bounds = array<i64: 4, 24, 30>}, {pipeline_mode = #tpu.pipeline_mode<synchronous>, transform_indices = @transform_1, window_bounds = array<i64: 32, 24>}, {pipeline_mode = #tpu.pipeline_mode<synchronous>, transform_indices = @transform_2, window_bounds = array<i64: 32, 1>}, {pipeline_mode = #tpu.pipeline_mode<synchronous>, transform_indices = @transform_3, window_bounds = array<i64: 1, 30>}, {pipeline_mode = #tpu.pipeline_mode<synchronous>, transform_indices = @transform_4, window_bounds = array<i64: 1, 30>}, {transform_indices = @transform_5, window_bounds = array<i64: 4, 16, 30>}]} {
    %c0 = arith.constant 0 : index
    %c0_0 = arith.constant 0 : index
    %c0_1 = arith.constant 0 : index
    %0 = vector.load %arg1[%c0, %c0_0, %c0_1] : memref<4x24x30xf32, #tpu.memory_space<vmem>>, vector<4x24x30xf32>
    %c0_2 = arith.constant 0 : index
    %c0_3 = arith.constant 0 : index
    %1 = vector.load %arg2[%c0_2, %c0_3] : memref<32x24xf32, #tpu.memory_space<vmem>>, vector<32x24xf32>
    %2 = vector.shape_cast %1 : vector<32x24xf32> to vector<1x32x24xf32>
    %3 = vector.shape_cast %2 : vector<1x32x24xf32> to vector<1x32x24xf32>
    %4 = vector.broadcast %3 : vector<1x32x24xf32> to vector<4x32x24xf32>
    "tpu.trace_start"() <{level = 10 : i32, message = "bok,bkl->bol"}> : () -> ()
    %cst = arith.constant dense<0.000000e+00> : vector<4x32x30xf32>
    %5 = tpu.matmul %4, %0, %cst {dimension_numbers = #tpu.dot_dimension_numbers<[2], [1], [1], [2], [0, 0, 0, 1, 1, 2], [0], [0]>} : vector<4x32x24xf32>, vector<4x24x30xf32>, vector<4x32x30xf32> -> vector<4x32x30xf32>
    "tpu.trace_stop"() : () -> ()
    %c0_4 = arith.constant 0 : index
    %c0_5 = arith.constant 0 : index
    %6 = vector.load %arg3[%c0_4, %c0_5] : memref<32x1xf32, #tpu.memory_space<vmem>>, vector<32x1xf32>
    %7 = vector.shape_cast %6 : vector<32x1xf32> to vector<1x32x1xf32>
    %8 = vector.broadcast %7 : vector<1x32x1xf32> to vector<4x32x30xf32>
    %9 = arith.addf %5, %8 : vector<4x32x30xf32>
    %10 = vector.extract_strided_slice %9 {offsets = [0, 0, 0], sizes = [4, 16, 30], strides = [1, 1, 1]} : vector<4x32x30xf32> to vector<4x16x30xf32>
    %11 = vector.extract_strided_slice %9 {offsets = [0, 16, 0], sizes = [4, 16, 30], strides = [1, 1, 1]} : vector<4x32x30xf32> to vector<4x16x30xf32>
    %cst_6 = arith.constant 0.000000e+00 : f32
    %12 = vector.broadcast %cst_6 : f32 to vector<4x16x30xf32>
    %13 = arith.cmpf ogt, %10, %12 : vector<4x16x30xf32>
    %cst_7 = arith.constant 0.00999999977 : f32
    %14 = vector.broadcast %cst_7 : f32 to vector<4x16x30xf32>
    %15 = arith.mulf %14, %10 : vector<4x16x30xf32>
    %16 = arith.select %13, %10, %15 : vector<4x16x30xi1>, vector<4x16x30xf32>
    %cst_8 = arith.constant dense<0.000000e+00> : vector<4x16xf32>
    %17 = vector.multi_reduction <add>, %16, %cst_8 [2] : vector<4x16x30xf32> to vector<4x16xf32>
    %18 = vector.shape_cast %17 : vector<4x16xf32> to vector<4x16x1xf32>
    %19 = arith.mulf %16, %16 : vector<4x16x30xf32>
    %cst_9 = arith.constant dense<0.000000e+00> : vector<4x16xf32>
    %20 = vector.multi_reduction <add>, %19, %cst_9 [2] : vector<4x16x30xf32> to vector<4x16xf32>
    %21 = vector.shape_cast %20 : vector<4x16xf32> to vector<4x16x1xf32>
    %cst_10 = arith.constant 0.0333333351 : f32
    %22 = vector.broadcast %cst_10 : f32 to vector<4x16x1xf32>
    %23 = arith.mulf %18, %22 : vector<4x16x1xf32>
    %cst_11 = arith.constant 0.0333333351 : f32
    %24 = vector.broadcast %cst_11 : f32 to vector<4x16x1xf32>
    %25 = arith.mulf %21, %24 : vector<4x16x1xf32>
    %26 = arith.mulf %23, %23 : vector<4x16x1xf32>
    %27 = arith.subf %25, %26 : vector<4x16x1xf32>
    %28 = vector.broadcast %23 : vector<4x16x1xf32> to vector<4x16x30xf32>
    %29 = arith.subf %16, %28 : vector<4x16x30xf32>
    %cst_12 = arith.constant 9.99999974E-6 : f32
    %30 = vector.broadcast %cst_12 : f32 to vector<4x16x1xf32>
    %31 = arith.addf %27, %30 : vector<4x16x1xf32>
    %32 = math.rsqrt %31 : vector<4x16x1xf32>
    %33 = vector.broadcast %32 : vector<4x16x1xf32> to vector<4x16x30xf32>
    %34 = arith.mulf %29, %33 : vector<4x16x30xf32>
    %c0_13 = arith.constant 0 : index
    %c0_14 = arith.constant 0 : index
    %35 = vector.load %arg4[%c0_13, %c0_14] : memref<1x30xf32, #tpu.memory_space<vmem>>, vector<1x30xf32>
    %36 = vector.shape_cast %35 : vector<1x30xf32> to vector<1x1x30xf32>
    %37 = vector.broadcast %36 : vector<1x1x30xf32> to vector<4x16x30xf32>
    %38 = arith.mulf %34, %37 : vector<4x16x30xf32>
    %c0_15 = arith.constant 0 : index
    %c0_16 = arith.constant 0 : index
    %39 = vector.load %arg5[%c0_15, %c0_16] : memref<1x30xf32, #tpu.memory_space<vmem>>, vector<1x30xf32>
    %40 = vector.shape_cast %39 : vector<1x30xf32> to vector<1x1x30xf32>
    %41 = vector.broadcast %40 : vector<1x1x30xf32> to vector<4x16x30xf32>
    %42 = arith.addf %38, %41 : vector<4x16x30xf32>
    %43 = arith.addf %42, %11 : vector<4x16x30xf32>
    %cst_17 = arith.constant 0.000000e+00 : f32
    %44 = vector.broadcast %cst_17 : f32 to vector<4x16x30xf32>
    %45 = arith.maximumf %43, %44 : vector<4x16x30xf32>
    %c0_18 = arith.constant 0 : index
    %c0_19 = arith.constant 0 : index
    %c0_20 = arith.constant 0 : index
    %46 = vector.load %arg6[%c0_18, %c0_19, %c0_20] : memref<4x16x30xf32, #tpu.memory_space<vmem>>, vector<4x16x30xf32>
    tpu.vector_store %arg6[%c0_18, %c0_19, %c0_20], %45 {strides = array<i32>} : memref<4x16x30xf32, #tpu.memory_space<vmem>>, vector<4x16x30xf32>,
    return
  }
  func.func @transform_0(%arg0: i32) -> (i32, i32, i32) {
    %c0_i32 = arith.constant 0 : i32
    %c0_i32_0 = arith.constant 0 : i32
    %c0_i32_1 = arith.constant 0 : i32
    return %arg0, %c0_i32, %c0_i32_0 : i32, i32, i32
  }
  func.func @transform_1(%arg0: i32) -> (i32, i32) {
    %c0_i32 = arith.constant 0 : i32
    %c0_i32_0 = arith.constant 0 : i32
    %c0_i32_1 = arith.constant 0 : i32
    return %c0_i32, %c0_i32_0 : i32, i32
  }
  func.func @transform_2(%arg0: i32) -> (i32, i32) {
    %c0_i32 = arith.constant 0 : i32
    %c0_i32_0 = arith.constant 0 : i32
    %c0_i32_1 = arith.constant 0 : i32
    return %c0_i32, %c0_i32_0 : i32, i32
  }
  func.func @transform_3(%arg0: i32) -> (i32, i32) {
    %c0_i32 = arith.constant 0 : i32
    %c0_i32_0 = arith.constant 0 : i32
    %c0_i32_1 = arith.constant 0 : i32
    return %c0_i32, %c0_i32_0 : i32, i32
  }
  func.func @transform_4(%arg0: i32) -> (i32, i32) {
    %c0_i32 = arith.constant 0 : i32
    %c0_i32_0 = arith.constant 0 : i32
    %c0_i32_1 = arith.constant 0 : i32
    return %c0_i32, %c0_i32_0 : i32, i32
  }
  func.func @transform_5(%arg0: i32) -> (i32, i32, i32) {
    %c0_i32 = arith.constant 0 : i32
    %c0_i32_0 = arith.constant 0 : i32
    %c0_i32_1 = arith.constant 0 : i32
    return %arg0, %c0_i32, %c0_i32_0 : i32, i32, i32
  }
}

</mosaic_0001>

<bundles_post_ra>
// kernel: tpu_custom_call.1
= control target key start
LH: loop header
LB: loop body
LE: loop exit
PB: predicated region body
PF: predicated region fallthrough
CT: control target
= control target key end

     0   :  { %10 = vsyncpa [#allocation3], 0  ;;  %s1625_s0 = inlined_call_operand.hbm [shape: f32[8,24,30], index: 0, kind: input, shape index: {}]   ;;  %s1626_s1 = inlined_call_operand.vmem [shape: f32[32,24], index: 1, kind: input, shape index: {}]   ;;  %s1627_s2 = inlined_call_operand.vmem [shape: f32[32,1], index: 2, kind: input, shape index: {}]   ;;  %s1628_s3 = inlined_call_operand.vmem [shape: f32[1,30], index: 3, kind: input, shape index: {}]   ;;  %s1629_s4 = inlined_call_operand.vmem [shape: f32[1,30], index: 4, kind: input, shape index: {}]   ;;  %s1630_s5 = inlined_call_operand.hbm [shape: f32[8,16,30], index: 5, kind: output, shape index: {}]  }
   0x1   :  { %12 = vsyncpa [#allocation3 + $0x1], 0 }
   0x2   :  { %13 = vsyncpa [#allocation4], 0 }
   0x3   :  { %15 = vsyncpa [#allocation4 + $0x1], 0  ;;  %s1259_s18 = smov 0   ;;  %s1261_s19 = smov 0  }
   0x4   :  { %s1263_s20 = smov 0   ;;  %s1265_s21 = smov 0  }
   0x5 LB: > { %s1280_s22 = sadd.s32 4294967295, %s1220_s21   ;;  %s926_s23 = sadd.s32 4294967294, %s1220_s21   ;;  %s1220_s21 = sphi %s1265_s21, %s1642_s21   ;;  %s1216_s20 = sphi %s1263_s20, %s1641_s20   ;;  %s1212_s19 = sphi %s1261_s19, %s1640_s19   ;;  %s1208_s18 = sphi %s1259_s18, %s1639_s18  }
   0x6   : > { %s1284_s24 = sadd.s32 1, %s1220_s21   ;;  %s28_s25 = sadd.s32 1, %s1216_s20 }
   0x7   : > { %s25_s26 = ssub.s32 %s1220_s21, %s1284_s24  ;;  %p35_p0 = scmp.ne.s32.totalorder %s1216_s20, %s1212_s19 }
   0x8   : > { %p26_p1 = scmp.eq.s32.totalorder %s25_s26, 0  ;;  %p36_p2 = scmp.eq.s32.totalorder %s1220_s21, 0 }
   0x9   : > { %p41_p3 = scmp.ne.s32.totalorder %s1212_s19, %s1208_s18  ;;  %p42_p4 = scmp.eq.s32.totalorder %s1280_s22, 0 }
   0xa   : > { %s1296_s27 = scalar_select %p26_p1, %s1216_s20, %s28_s25  }
   0xb   : > { %p37_p5 = por %p36_p2, %p35_p0  ;;  %p1298_p6 = por %p42_p4, %p41_p3 }
   0xc   : > { %p149_p7 = scmp.eq.s32.totalorder %s1280_s22, 1  ;;  %p155_p8 = scmp.eq.s32.totalorder %s926_s23, 1 }
   0xd   : > { %p1067_p10 = scmp.lt.s32.totalorder %s1220_s21, 2  ;;  %s187_s6 = sand.u32 1, %s1216_s20  }
   0xe   : > { %p1305_p11 = por %p149_p7, %p35_p0  ;;  %p1309_p12 = por %p155_p8, %p41_p3 }
   0xf   : > { %s1053_s7 = smul.u32 1536, %s1220_s21  ;;  %p1320_p13 = pnand %p1067_p10, %p37_p5 }
  0x10   : > { %s1633_s29 = scalar_select %p1305_p11, 1, 0 }
  0x11   : > { %s1634_s30 = scalar_select %p1309_p12, 1, 0 }
  0x12   : > { %s1052_s8 = smul.u32 96, %s187_s6  ;;  %s1318_s11 = scalar_lea.hbm %s1625_s0, %s1053_s7 }
  0x13   : > { %s1326_s15 = scalar_lea.sflag [#allocation3], %s187_s6  ;;  %s1124_s16 = scalar_lea.hbm %s1318_s11, 1536 }
  0x14   : > { %s191_s13 = scalar_lea.vmem [#allocation2], %s1052_s8  ;;  %p1125_p0 = scmp.ne.s32.totalorder %s1318_s11, %s1124_s16 }
  0x15   : > { %s199_s14 = sshll.u32 %s191_s13, 4  ;;  %p1126_p1 = pneg %p1320_p13  ;;  %s1324_s14 = int_to_ptr.vmem [resolvable:$true] %s199_s14 }
  0x16   : > { %s1129_s25 = scalar_lea.hbm %s1625_s0, 3072  ;;  %p1130_p4 = scmp.lt.u32.totalorder %s1318_s11, %s1625_s0 }
  0x17   : > { %p1127_p2 = pnand %p1126_p1, %p1125_p0  ;;  %p1131_p5 = scmp.lt.u32.totalorder %s1129_s25, %s1124_s16 }
  0x18   : > { %p1133_p8 = scmp.lt.u32.totalorder %s1124_s16, %s1318_s11 }
  0x19   : > { %p1128_p3 = pneg %p1127_p2  ;;  %p1132_p7 = por %p1131_p5, %p1130_p4 }
  0x1b   : > { %p1134_p10 = por %p1133_p8, %p1132_p7 }
  0x1d   : > { %p1135_p9 = pnand %p1134_p10, %p1128_p3 }
  0x1f   : > { %1138 = shalt.err (!%p1135_p9)
}
  0x20   : > { %s1139_s6 = scalar_lea.vmem %s1324_s14, 1536  ;;  %s1222_s8 = smov [#allocation2]  }
  0x21   : > { %p1140_p0 = scmp.ne.s32.totalorder %s1324_s14, %s1139_s6  ;;  %s1144_s9 = sshll.u32 %s1222_s8, 4  ;;  %s1145_s9 = int_to_ptr.vmem [resolvable:$false] %s1144_s9 }
  0x22   : > { %s1146_s10 = scalar_lea.vmem %s1145_s9, 3072  ;;  %p1147_p11 = scmp.lt.s32.totalorder %s1324_s14, %s1145_s9 }
  0x23   : > { %p1142_p2 = pnand %p1140_p0, %p1126_p1  ;;  %p1148_p4 = scmp.lt.s32.totalorder %s1146_s10, %s1139_s6 }
  0x25   : > { %p1143_p12 = pneg %p1142_p2  ;;  %p1149_p5 = por %p1148_p4, %p1147_p11 }
  0x27   : > { %p1150_p7 = pnand %p1149_p5, %p1143_p12 }
  0x29   : > { %1153 = shalt.err (!%p1150_p7)
}
  0x2a   : > { %s1223_s13 = smov 128   ;;  %s1224_s16 = smov 8  }
  0x2b   : > { %1062 = dma.hbm_to_vmem [thread:$0]  (!%p1320_p13), %s1318_s11, 1536, %s1324_s14, %s1326_s15, %s1223_s13, %s1223_s13, %s1224_s16  }
  0x2c   : > { %p932_p9 = scmp.ge.s32.totalorder %s1220_s21, 1  ;;  %p207_p1 = scmp.lt.s32.totalorder %s1220_s21, 3 }
  0x2e   : > { %p208_p3 = pnand %p932_p9, %p207_p1 }
  0x2f   : > { %s1357_s17 = sand.u32 (!%p208_p3), 1, %s1212_s19  }
  0x30   : > { %211 = sbr.rel (%p208_p3) target bundleno = 511 (0x1ff), region = 40  ;;  %s214_s25 = scalar_lea.sflag (!%p208_p3), [#allocation3], %s1357_s17 }
  0x31   : > { %s1054_s23 = smul.u32 (!%p208_p3), 96, %s1357_s17 }
  0x33   : > { %s1361_s26 = scalar_lea.vmem (!%p208_p3), [#allocation2], %s1054_s23 }
  0x37   : > { %1199 = dma.done.wait (%p1298_p6), %s214_s25, 1536  }
  0x38   : > { %1201 = vsyncadd (%p1298_p6), %s214_s25, 4294965760  ;;  %v1225_v0 = vmov 0   ;;  %v246_v1 = vld [vmem:[%s1361_s26] sm:$0xff]  ;;  %v247_v2 = vld [vmem:[%s1361_s26 + $0x8] sm:$0xff]  ;;  %vm286_vm0 = vcmask 195584   ;;  %vm663_vm1 = vcmask 244736  }
  0x39   : > { %1106 = vset.pattern.permute.xlu0 %v1225_v0  ;;  %1107 = vset.pattern.permute.xlu1 %v1225_v0  ;;  %v249_v3 = vld [vmem:[%s1361_s26 + $0x18] sm:$0xff]  ;;  %v1036_v4 = vpack.c.bf16 %v247_v2, %v246_v1  ;;  %v250_v5 = vld [vmem:[%s1361_s26 + $0x20] sm:$0xff]  ;;  %v248_v7 = vld [vmem:[%s1361_s26 + $0x10] sm:$0xff]  ;;  %s933_s7 = sshll.u32 %s1357_s17, 6  ;;  %s959_s8 = sshll.u32 %s1280_s22, 10 }
  0x3a   : > { %v1040_v6 = vpack.c.bf16 %v250_v5, %v249_v3  ;;  %v258_v8 = vld [vmem:[%s1626_s1] sm:$0xff]  ;;  %v251_v9 = vld [vmem:[%s1361_s26 + $0x28] sm:$0xff]  ;;  %v252_v10 = vld [vmem:[%s1361_s26 + $0x30] sm:$0xff]  ;;  %s1528_s6 = scalar_lea.vmem [#allocation5], %s933_s7  ;;  %s1577_s16 = scalar_lea.hbm %s1630_s5, %s959_s8 }
  0x3b   : > { %1037 = vmatprep.subr.bf16.mxu0 %v1036_v4  ;;  %994 = vmatprep.mubr.msk.f32.mxu0 %vm286_vm0, %v258_v8  ;;  %v253_v11 = vld [vmem:[%s1361_s26 + $0x38] sm:$0xff]  ;;  %v255_v12 = vld [vmem:[%s1361_s26 + $0x48] sm:$0xff]  ;;  %v256_v13 = vld [vmem:[%s1361_s26 + $0x50] sm:$0xff]  ;;  %s853_s9 = sshll.u32 %s1528_s6, 4  ;;  %s839_s23 = scalar_lea.sflag [#allocation4], %s1357_s17  ;;  %s1579_s9 = int_to_ptr.vmem [resolvable:$true] %s853_s9 }
  0x3c   : > { %1041 = vmatprep.subr.bf16.mxu1 %v1040_v6  ;;  %1039 = vmatpush3.bf16.msra.mxu0 %v1036_v4  ;;  %v262_v14 = vld [vmem:[%s1627_s2] sm:$0xff]  ;;  %v259_v15 = vld [vmem:[%s1626_s1 + $0x8] sm:$0xff]  ;;  %v1044_v16 = vpack.c.bf16 %v253_v11, %v252_v10  ;;  %v1048_v17 = vpack.c.bf16 %v256_v13, %v255_v12  ;;  %v260_v18 = vld [vmem:[%s1626_s1 + $0x10] sm:$0xff]  ;;  %s1154_s25 = scalar_lea.vmem %s1579_s9, 1024  ;;  %p1636_p11 = scmp.ne.s32.totalorder %s1633_s29, 0 }
  0x3d   : > { %1043 = vmatpush3.bf16.msra.mxu1 %v1040_v6  ;;  %992 = vmatprep.subr.mxu0 %v248_v7  ;;  %v261_v19 = vld [vmem:[%s1626_s1 + $0x18] sm:$0xff]  ;;  %v254_v20 = vld [vmem:[%s1361_s26 + $0x40] sm:$0xff]  ;;  %v263_v22 = vld [vmem:[%s1627_s2 + $0x8] sm:$0xff]  ;;  %p1155_p6 = scmp.ne.s32.totalorder %s1579_s9, %s1154_s25  ;;  %s1226_s22 = smov [#allocation5]  }
  0x3e   : > { %1004 = vmatprep.subr.mxu1 %v251_v9  ;;  %1006 = vmatprep.mubr.msk.f32.mxu1 %vm286_vm0, %v258_v8  ;;  %v257_v21 = vld [vmem:[%s1361_s26 + $0x58] sm:$0xff]  ;;  %s1158_s26 = sshll.u32 %s1226_s22, 4  ;;  %s1159_s26 = int_to_ptr.vmem [resolvable:$false] %s1158_s26 }
  0x3f   : > { %268 = vperm.xlu0 %1106, %v262_v14   ;;  %p1156_p12 = pnand %p1155_p6, %p1636_p11  ;;  %s1160_s28 = scalar_lea.vmem %s1159_s26, 2048 }
  0x40   : > { %993 = vmatpush3.msra.mxu0 %v248_v7  ;;  %p1161_p8 = scmp.lt.s32.totalorder %s1579_s9, %s1159_s26  ;;  %p1162_p10 = scmp.lt.s32.totalorder %s1160_s28, %s1154_s25 }
  0x41   : > { %1005 = vmatpush3.msra.mxu1 %v251_v9  ;;  %995 = vmatmul.mubr.msk.f32.vlgmr.msra.gmra.mrb[0].mxu0 %vm286_vm0, %v259_v15  ;;  %p1157_p13 = pneg %p1156_p12 }
  0x42   : > { %1007 = vmatmul.mubr.msk.f32.vlgmr.msra.gmra.mrb[0].mxu1 %vm286_vm0, %v259_v15  ;;  %1045 = vmatprep.subr.bf16.mxu0 %v1044_v16  ;;  %p1163_p0 = por %p1162_p10, %p1161_p8 }
  0x43   : > { %1049 = vmatprep.subr.bf16.mxu1 %v1048_v17  ;;  %997 = vmatprep.mubr.msk.f32.mxu0 %vm286_vm0, %v260_v18 }
  0x44   : > { %1009 = vmatprep.mubr.msk.f32.mxu1 %vm286_vm0, %v260_v18  ;;  %1047 = vmatpush3.bf16.msra.mxu0 %v1044_v16  ;;  %v265_v16 = vld [vmem:[%s1627_s2 + $0x18] sm:$0xff]  ;;  %p1164_p2 = pnand %p1163_p0, %p1157_p13 }
  0x45   : > { %1051 = vmatpush3.bf16.msra.mxu1 %v1048_v17  ;;  %998 = vmatmul.mubr.msk.f32.gmra.mrb[2].mxu0 %vm286_vm0, %v261_v19 }
  0x46   : > { %1010 = vmatmul.mubr.msk.f32.gmra.mrb[2].mxu1 %vm286_vm0, %v261_v19  ;;  %1016 = vmatprep.subr.mxu0 %v254_v20 }
  0x47   : > { %1028 = vmatprep.subr.mxu1 %v257_v21  ;;  %1018 = vmatprep.mubr.msk.f32.mxu0 %vm286_vm0, %v258_v8 }
  0x48   : > { %1017 = vmatpush3.msra.mxu0 %v254_v20  ;;  %1030 = vmatprep.mubr.msk.f32.mxu1 %vm286_vm0, %v258_v8 }
  0x49   : > { %1029 = vmatpush3.msra.mxu1 %v257_v21  ;;  %1019 = vmatmul.mubr.msk.f32.vlgmr.msra.gmra.mrb[4].mxu0 %vm286_vm0, %v259_v15 }
  0x4a   : > { %1031 = vmatmul.mubr.msk.f32.vlgmr.msra.gmra.mrb[4].mxu1 %vm286_vm0, %v259_v15  ;;  %273 = vperm.xlu0 %1106, %v263_v22  }
  0x4b   : > { %1021 = vmatprep.mubr.msk.f32.mxu0 %vm286_vm0, %v260_v18  ;;  %1033 = vmatprep.mubr.msk.f32.mxu1 %vm286_vm0, %v260_v18 }
  0x4d   : > { %1022 = vmatmul.mubr.msk.f32.gmra.mrb[6].mxu0 %vm286_vm0, %v261_v19 }
  0x4e   : > { %1034 = vmatmul.mubr.msk.f32.gmra.mrb[6].mxu1 %vm286_vm0, %v261_v19 }
  0xbe   : > { %v1413_v23 = vpop.permute.xlu0 %268 }
  0xc9   : > { %v274_v24 = vpop.permute.xlu0 %273 }
 0x114   : > { %v996_v25 = vpop.f32.mrb[0].mxu0 }
 0x115   : > { %v371_v26 = vadd.f32 %v996_v25, %v274_v24  ;;  %v1008_v27 = vpop.f32.mrb[0].mxu1  ;;  %v365_v28 = vpop.f32.mrb[1].mxu0 }
 0x116   : > { %v456_v29 = vadd.f32 %v1008_v27, %v274_v24  ;;  %v450_v30 = vpop.f32.mrb[1].mxu1  ;;  %v366_v32 = vadd.f32 %v365_v28, %v1413_v23 }
 0x117   : > { %v648_v31 = vmul.f32 0.01, %v371_v26  ;;  %v451_v33 = vadd.f32 %v450_v30, %v1413_v23  ;;  %vm640_vm2 = vcmp.gt.f32.partialorder %v371_v26, 0.0 }
 0x118   : > { %v650_v34 = vmul.f32 0.01, %v456_v29  ;;  %v1417_v35 = vpop.f32.mrb[2].mxu0  ;;  %vm642_vm3 = vcmp.gt.f32.partialorder %v456_v29, 0.0  ;;  %v647_v43 = vmul.f32 0.01, %v366_v32 }
 0x119   : > { %v649_v36 = vmul.f32 0.01, %v451_v33  ;;  %v1419_v37 = vpop.f32.mrb[2].mxu1  ;;  %v1421_v38 = vsel %vm640_vm2, %v371_v26, %v648_v31  ;;  %v1423_v39 = vpop.f32.mrb[3].mxu0  ;;  %vm641_vm4 = vcmp.gt.f32.partialorder %v451_v33, 0.0  ;;  %vm639_vm5 = vcmp.gt.f32.partialorder %v366_v32, 0.0 }
 0x11a   : > { %v1425_v40 = vpop.f32.mrb[3].mxu1  ;;  %v667_v41 = vsel %vm663_vm1, %v1421_v38, 0.0  ;;  %v1429_v42 = vsel %vm642_vm3, %v456_v29, %v650_v34  ;;  %v1439_v55 = vsel %vm639_vm5, %v366_v32, %v647_v43  ;;  %v689_v61 = vmul.f32 %v1421_v38, %v1421_v38 }
 0x11b   : > { %668 = vadd.xlane.f32.xlu1 %v667_v41  ;;  %v1431_v44 = vsel %vm641_vm4, %v451_v33, %v649_v36  ;;  %v691_v47 = vmul.f32 %v1429_v42, %v1429_v42  ;;  %v673_v53 = vsel %vm663_vm1, %v1429_v42, 0.0  ;;  %v664_v59 = vsel %vm663_vm1, %v1439_v55, 0.0 }
 0x11c   : > { %v670_v45 = vsel %vm663_vm1, %v1431_v44, 0.0  ;;  %v1020_v46 = vpop.f32.mrb[4].mxu0  ;;  %v699_v1 = vsel %vm663_vm1, %v689_v61, 0.0  ;;  %v688_v2 = vmul.f32 %v1439_v55, %v1439_v55  ;;  %v690_v5 = vmul.f32 %v1431_v44, %v1431_v44 }
 0x11d   : > { %v1032_v48 = vpop.f32.mrb[4].mxu1  ;;  %671 = vadd.xlane.f32.xlu0 %v670_v45  ;;  %v541_v49 = vadd.f32 %v1020_v46, %v274_v24  ;;  %v535_v50 = vpop.f32.mrb[5].mxu0  ;;  %v705_v57 = vsel %vm663_vm1, %v691_v47, 0.0 }
 0x11e   : > { %v626_v51 = vadd.f32 %v1032_v48, %v274_v24  ;;  %v620_v52 = vpop.f32.mrb[5].mxu1  ;;  %v696_v4 = vsel %vm663_vm1, %v688_v2, 0.0  ;;  %v702_v6 = vsel %vm663_vm1, %v690_v5, 0.0  ;;  %v536_v7 = vadd.f32 %v535_v50, %v1413_v23  ;;  %v264_v24 = vld [vmem:[%s1627_s2 + $0x10] sm:$0xff] }
 0x11f   : > { %vm644_vm6 = vcmp.gt.f32.partialorder %v541_v49, 0.0  ;;  %v652_v54 = vmul.f32 0.01, %v541_v49  ;;  %674 = vadd.xlane.f32.xlu1 %v673_v53  ;;  %v621_v10 = vadd.f32 %v620_v52, %v1413_v23 }
 0x120   : > { %vm646_vm7 = vcmp.gt.f32.partialorder %v626_v51, 0.0  ;;  %v654_v56 = vmul.f32 0.01, %v626_v51  ;;  %v651_v9 = vmul.f32 0.01, %v536_v7  ;;  %vm643_vm8 = vcmp.gt.f32.partialorder %v536_v7, 0.0 }
 0x121   : > { %706 = vadd.xlane.f32.xlu0 %v705_v57  ;;  %v1442_v58 = vsel %vm644_vm6, %v541_v49, %v652_v54  ;;  %v653_v12 = vmul.f32 0.01, %v621_v10  ;;  %vm645_vm9 = vcmp.gt.f32.partialorder %v621_v10, 0.0  ;;  %v1482_v19 = vpop.f32.mrb[6].mxu1  ;;  %v1484_v20 = vpop.f32.mrb[6].mxu0 }
 0x122   : > { %v693_v60 = vmul.f32 %v1442_v58, %v1442_v58  ;;  %v1450_v62 = vsel %vm646_vm7, %v626_v51, %v654_v56  ;;  %v679_v8 = vsel %vm663_vm1, %v1442_v58, 0.0  ;;  %v1469_v13 = vsel %vm643_vm8, %v536_v7, %v651_v9  ;;  %v1493_v25 = vpop.f32.mrb[7].mxu0  ;;  %v1495_v26 = vpop.f32.mrb[7].mxu1 }
 0x123   : > { %665 = vadd.xlane.f32.xlu1 %v664_v59  ;;  %v695_v0 = vmul.f32 %v1450_v62, %v1450_v62  ;;  %v685_v11 = vsel %vm663_vm1, %v1450_v62, 0.0  ;;  %v676_v14 = vsel %vm663_vm1, %v1469_v13, 0.0  ;;  %v1473_v15 = vsel %vm645_vm9, %v621_v10, %v653_v12 }
 0x124   : > { %v711_v63 = vsel %vm663_vm1, %v693_v60, 0.0  ;;  %v682_v17 = vsel %vm663_vm1, %v1473_v15, 0.0  ;;  %v692_v18 = vmul.f32 %v1469_v13, %v1469_v13  ;;  %v694_v22 = vmul.f32 %v1473_v15, %v1473_v15 }
 0x125   : > { %712 = vadd.xlane.f32.xlu0 %v711_v63  ;;  %v717_v3 = vsel %vm663_vm1, %v695_v0, 0.0 }
 0x126   : > { %v708_v21 = vsel %vm663_vm1, %v692_v18, 0.0  ;;  %v714_v23 = vsel %vm663_vm1, %v694_v22, 0.0 }
 0x127   : > { %700 = vadd.xlane.f32.xlu1 %v699_v1 }
 0x129   : > { %718 = vadd.xlane.f32.xlu0 %v717_v3 }
 0x12b   : > { %697 = vadd.xlane.f32.xlu1 %v696_v4  ;;  %v1509_v4 = vld [vmem:[%s1628_s3] ss:$0 sm:$0xff] }
 0x12f   : > { %703 = vadd.xlane.f32.xlu1 %v702_v6 }
 0x133   : > { %680 = vadd.xlane.f32.xlu1 %v679_v8  ;;  %v1514_v8 = vld [vmem:[%s1629_s4] ss:$0 sm:$0xff] }
 0x137   : > { %686 = vadd.xlane.f32.xlu1 %v685_v11 }
 0x13b   : > { %677 = vadd.xlane.f32.xlu1 %v676_v14 }
 0x13f   : > { %283 = vperm.xlu0 %1106, %v265_v16   ;;  %683 = vadd.xlane.f32.xlu1 %v682_v17 }
 0x143   : > { %709 = vadd.xlane.f32.xlu1 %v708_v21 }
 0x147   : > { %715 = vadd.xlane.f32.xlu1 %v714_v23 }
 0x158   : > { %278 = vperm.xlu1 %1107, %v264_v24  }
 0x1a8   : > { %v669_v27 = vpop.xlane.xlu1 %668 }
 0x1a9   : > { %v721_v36 = vmul.f32 0.033333335, %v669_v27 }
 0x1aa   : > { %v672_v28 = vpop.xlane.xlu0 %671 }
 0x1ab   : > { %v737_v46 = vmul.f32 %v721_v36, %v721_v36  ;;  %v1499_v52 = vmul.f32 0.033333335, %v672_v28  ;;  %v753_v14 = vsub.f32 %v1421_v38, %v721_v36 }
 0x1ac   : > { %v675_v29 = vpop.xlane.xlu1 %674 }
 0x1ad   : > { %v723_v30 = vmul.f32 0.033333335, %v675_v29  ;;  %v738_v60 = vmul.f32 %v1499_v52, %v1499_v52 }
 0x1ae   : > { %v707_v31 = vpop.xlane.xlu0 %706 }
 0x1af   : > { %v739_v32 = vmul.f32 %v723_v30, %v723_v30  ;;  %v731_v33 = vmul.f32 0.033333335, %v707_v31  ;;  %v755_v0 = vsub.f32 %v1429_v42, %v723_v30 }
 0x1b0   : > { %v666_v34 = vpop.xlane.xlu1 %665 }
 0x1b1   : > { %v747_v41 = vsub.f32 %v731_v33, %v739_v32  ;;  %v1497_v47 = vmul.f32 0.033333335, %v666_v34 }
 0x1b2   : > { %v713_v49 = vpop.xlane.xlu0 %712 }
 0x1b3   : > { %v763_v43 = vadd.f32 1e-05, %v747_v41  ;;  %v736_v53 = vmul.f32 %v1497_v47, %v1497_v47  ;;  %v733_v11 = vmul.f32 0.033333335, %v713_v49  ;;  %v752_v49 = vsub.f32 %v1439_v55, %v1497_v47 }
 0x1b4   : > { %v701_v45 = vpop.xlane.xlu1 %700 }
 0x1b5   : > { %1108 = vrsqrt.f32 %v763_v43  ;;  %v729_v48 = vmul.f32 0.033333335, %v701_v45 }
 0x1b6   : > { %v719_v61 = vpop.xlane.xlu0 %718 }
 0x1b7   : > { %v745_v50 = vsub.f32 %v729_v48, %v737_v46  ;;  %v735_v28 = vmul.f32 0.033333335, %v719_v61 }
 0x1b8   : > { %v698_v51 = vpop.xlane.xlu1 %697 }
 0x1b9   : > { %v761_v54 = vadd.f32 1e-05, %v745_v50  ;;  %v728_v56 = vmul.f32 0.033333335, %v698_v51 }
 0x1bb   : > { %1110 = vrsqrt.f32 %v761_v54  ;;  %v744_v57 = vsub.f32 %v728_v56, %v736_v53 }
 0x1bc   : > { %v704_v59 = vpop.xlane.xlu1 %703 }
 0x1bd   : > { %v730_v63 = vmul.f32 0.033333335, %v704_v59  ;;  %v760_v2 = vadd.f32 1e-05, %v744_v57 }
 0x1be   : > { %v1516_v9 = vpop.permute.xlu0 %283 }
 0x1bf   : > { %v1109_v1 = vpop.eup %1108  ;;  %v746_v3 = vsub.f32 %v730_v63, %v738_v60  ;;  %1112 = vrsqrt.f32 %v760_v2  ;;  %v466_v17 = vadd.f32 %v1419_v37, %v1516_v9  ;;  %v381_v34 = vadd.f32 %v1417_v35, %v1516_v9 }
 0x1c0   : > { %v779_v5 = vmul.f32 %v1109_v1, %v755_v0  ;;  %v681_v6 = vpop.xlane.xlu1 %680  ;;  %v754_v35 = vsub.f32 %v1431_v44, %v1499_v52 }
 0x1c1   : > { %v762_v7 = vadd.f32 1e-05, %v746_v3  ;;  %v725_v42 = vmul.f32 0.033333335, %v681_v6 }
 0x1c2   : > { %v794_v10 = vmul.f32 %v1509_v4, %v779_v5 }
 0x1c3   : > { %v741_v12 = vmul.f32 %v725_v42, %v725_v42  ;;  %1114 = vrsqrt.f32 %v762_v7  ;;  %v757_v60 = vsub.f32 %v1442_v58, %v725_v42  ;;  %v551_v58 = vadd.f32 %v1484_v20, %v1516_v9 }
 0x1c4   : > { %v809_v16 = vadd.f32 %v1514_v8, %v794_v10  ;;  %v687_v18 = vpop.xlane.xlu1 %686 }
 0x1c5   : > { %v1111_v21 = vpop.eup %1110  ;;  %v749_v22 = vsub.f32 %v733_v11, %v741_v12  ;;  %v727_v23 = vmul.f32 0.033333335, %v687_v18 }
 0x1c6   : > { %v777_v24 = vmul.f32 %v1111_v21, %v753_v14  ;;  %v817_v27 = vadd.f32 %v809_v16, %v466_v17 }
 0x1c7   : > { %v765_v29 = vadd.f32 1e-05, %v749_v22  ;;  %v743_v30 = vmul.f32 %v727_v23, %v727_v23  ;;  %v759_v5 = vsub.f32 %v1450_v62, %v727_v23  ;;  %v636_v23 = vadd.f32 %v1482_v19, %v1516_v9 }
 0x1c8   : > { %v792_v31 = vmul.f32 %v1509_v4, %v777_v24  ;;  %v825_v32 = vmax.f32 %v817_v27, 0.0  ;;  %v678_v38 = vpop.xlane.xlu1 %677 }
 0x1c9   : > { %1116 = vrsqrt.f32 %v765_v29  ;;  %v751_v33 = vsub.f32 %v735_v28, %v743_v30  ;;  %v1113_v45 = vpop.eup %1112  ;;  %v724_v46 = vmul.f32 0.033333335, %v678_v38 }
 0x1ca   : > { %v807_v37 = vadd.f32 %v1514_v8, %v792_v31  ;;  %833 = vst.msk [vmem:[%s1528_s6 + $0x18] sm:$0xff] %vm663_vm1, %v825_v32  ;;  %v776_v53 = vmul.f32 %v1113_v45, %v752_v49 }
 0x1cb   : > { %v767_v36 = vadd.f32 1e-05, %v751_v33  ;;  %v740_v54 = vmul.f32 %v724_v46, %v724_v46  ;;  %v756_v30 = vsub.f32 %v1469_v13, %v724_v46 }
 0x1cc   : > { %v815_v41 = vadd.f32 %v807_v37, %v381_v34  ;;  %v684_v43 = vpop.xlane.xlu1 %683  ;;  %v791_v55 = vmul.f32 %v1509_v4, %v776_v53 }
 0x1cd   : > { %1118 = vrsqrt.f32 %v767_v36  ;;  %v1115_v48 = vpop.eup %1114  ;;  %v726_v56 = vmul.f32 0.033333335, %v684_v43 }
 0x1ce   : > { %v823_v50 = vmax.f32 %v815_v41, 0.0  ;;  %v778_v59 = vmul.f32 %v1115_v48, %v754_v35  ;;  %v806_v11 = vadd.f32 %v1514_v8, %v791_v55 }
 0x1cf   : > { %v742_v47 = vmul.f32 %v726_v56, %v726_v56  ;;  %v758_v9 = vsub.f32 %v1473_v15, %v726_v56 }
 0x1d0   : > { %831 = vst.msk [vmem:[%s1528_s6 + $0x8] sm:$0xff] %vm663_vm1, %v823_v50  ;;  %v710_v51 = vpop.xlane.xlu1 %709  ;;  %v793_v44 = vmul.f32 %v1509_v4, %v778_v59 }
 0x1d1   : > { %v732_v57 = vmul.f32 0.033333335, %v710_v51 }
 0x1d2   : > { %v808_v16 = vadd.f32 %v1514_v8, %v793_v44 }
 0x1d3   : > { %v1117_v61 = vpop.eup %1116  ;;  %v748_v63 = vsub.f32 %v732_v57, %v740_v54 }
 0x1d4   : > { %v781_v0 = vmul.f32 %v1117_v61, %v757_v60  ;;  %v716_v1 = vpop.xlane.xlu1 %715 }
 0x1d5   : > { %v764_v2 = vadd.f32 1e-05, %v748_v63  ;;  %v734_v3 = vmul.f32 0.033333335, %v716_v1 }
 0x1d6   : > { %v796_v52 = vmul.f32 %v1509_v4, %v781_v0 }
 0x1d7   : > { %v1119_v6 = vpop.eup %1118  ;;  %1120 = vrsqrt.f32 %v764_v2  ;;  %v750_v7 = vsub.f32 %v734_v3, %v742_v47 }
 0x1d8   : > { %v811_v42 = vadd.f32 %v1514_v8, %v796_v52  ;;  %v783_v10 = vmul.f32 %v1119_v6, %v759_v5  ;;  %v279_v12 = vpop.permute.xlu1 %278 }
 0x1d9   : > { %v766_v14 = vadd.f32 1e-05, %v750_v7  ;;  %v376_v62 = vadd.f32 %v1423_v39, %v279_v12  ;;  %v461_v17 = vadd.f32 %v1425_v40, %v279_v12  ;;  %v546_v32 = vadd.f32 %v1493_v25, %v279_v12 }
 0x1da   : > { %v819_v18 = vadd.f32 %v811_v42, %v551_v58  ;;  %v798_v21 = vmul.f32 %v1509_v4, %v783_v10  ;;  %v631_v13 = vadd.f32 %v1495_v26, %v279_v12 }
 0x1db   : > { %1122 = vrsqrt.f32 %v766_v14  ;;  %v814_v20 = vadd.f32 %v806_v11, %v376_v62  ;;  %v816_v22 = vadd.f32 %v808_v16, %v461_v17 }
 0x1dc   : > { %v827_v24 = vmax.f32 %v819_v18, 0.0  ;;  %v813_v27 = vadd.f32 %v1514_v8, %v798_v21 }
 0x1dd   : > { %v822_v28 = vmax.f32 %v814_v20, 0.0  ;;  %v824_v29 = vmax.f32 %v816_v22, 0.0 }
 0x1de   : > { %835 = vst.msk [vmem:[%s1528_s6 + $0x28] sm:$0xff] %vm663_vm1, %v827_v24  ;;  %v821_v39 = vadd.f32 %v813_v27, %v636_v23 }
 0x1df   : > { %830 = vst.msk [vmem:[%s1528_s6] sm:$0xff] %vm663_vm1, %v822_v28  ;;  %832 = vst.msk [vmem:[%s1528_s6 + $0x10] sm:$0xff] %vm663_vm1, %v824_v29 }
 0x1e0   : > { %v829_v40 = vmax.f32 %v821_v39, 0.0 }
 0x1e1   : > { %v1121_v31 = vpop.eup %1120 }
 0x1e2   : > { %837 = vst.msk [vmem:[%s1528_s6 + $0x38] sm:$0xff] %vm663_vm1, %v829_v40  ;;  %v780_v19 = vmul.f32 %v1121_v31, %v756_v30 }
 0x1e4   : > { %v795_v38 = vmul.f32 %v1509_v4, %v780_v19 }
 0x1e5   : > { %v1123_v33 = vpop.eup %1122 }
 0x1e6   : > { %v810_v34 = vadd.f32 %v1514_v8, %v795_v38  ;;  %v782_v37 = vmul.f32 %v1123_v33, %v758_v9 }
 0x1e8   : > { %v818_v36 = vadd.f32 %v810_v34, %v546_v32  ;;  %v797_v41 = vmul.f32 %v1509_v4, %v782_v37 }
 0x1ea   : > { %v826_v43 = vmax.f32 %v818_v36, 0.0  ;;  %v812_v45 = vadd.f32 %v1514_v8, %v797_v41 }
 0x1ec   : > { %834 = vst.msk [vmem:[%s1528_s6 + $0x20] sm:$0xff] %vm663_vm1, %v826_v43  ;;  %v820_v15 = vadd.f32 %v812_v45, %v631_v13 }
 0x1ee   : > { %v828_v25 = vmax.f32 %v820_v15, 0.0 }
 0x1f0   : > { %836 = vst.msk [vmem:[%s1528_s6 + $0x30] sm:$0xff] %vm663_vm1, %v828_v25 }
 0x1f1   : > { %1167 = shalt.err (!%p1164_p2)
}
 0x1f2   : > { %s1168_s11 = scalar_lea.hbm %s1577_s16, 1024  ;;  %s1172_s15 = scalar_lea.hbm %s1630_s5, 2048 }
 0x1f3   : > { %p1169_p4 = scmp.ne.s32.totalorder %s1577_s16, %s1168_s11  ;;  %p1173_p9 = scmp.lt.u32.totalorder %s1577_s16, %s1630_s5 }
 0x1f4   : > { %p1174_p1 = scmp.lt.u32.totalorder %s1172_s15, %s1168_s11  ;;  %p1176_p6 = scmp.lt.u32.totalorder %s1168_s11, %s1577_s16 }
 0x1f5   : > { %p1170_p5 = pnand %p1169_p4, %p1636_p11 }
 0x1f6   : > { %p1175_p3 = por %p1174_p1, %p1173_p9 }
 0x1f7   : > { %p1171_p7 = pneg %p1170_p5 }
 0x1f8   : > { %p1177_p12 = por %p1176_p6, %p1175_p3 }
 0x1fa   : > { %p1178_p13 = pnand %p1177_p12, %p1171_p7 }
 0x1fc   : > { %1181 = shalt.err (!%p1178_p13)
}
 0x1fd   : > { %s1227_s8 = smov 128   ;;  %s1228_s10 = smov 8  }
 0x1fe   : > { %1057 = dma.vmem_to_hbm [thread:$0]  (%p1636_p11), %s1579_s9, 1024, %s1577_s16, %s839_s23, %s1227_s8, %s1227_s8, %s1228_s10  }
 0x1ff PF: > { %s868_s13 = sand.u32 1, %s1208_s18   ;;  %p1637_p8 = scmp.ne.s32.totalorder %s1634_s30, 0 }
 0x200   : > { %p1638_p10 = scmp.ge.s32.totalorder %s1220_s21, 2  ;;  %s869_s25 = scalar_lea.sflag [#allocation4], %s868_s13 }
 0x202   : > { %p1064_p0 = pnand %p1638_p10, %p1637_p8 }
 0x204   : > { %1203 = dma.done.wait (!%p1064_p0), %s869_s25, 1024  }
 0x205   : > { %1205 = vsyncadd (!%p1064_p0), %s869_s25, 4294966272  ;;  %p18_p2 = scmp.ge.s32.totalorder %s1284_s24, 4   ;;  %s1639_s18 = smov %s1212_s19 }
 0x206   : > { %s1640_s19 = smov %s1216_s20  ;;  %s1641_s20 = smov %s1296_s27 }
 0x207   : > { %s1642_s21 = smov %s1284_s24  ;;  %20 = sbr.rel (!%p18_p2) target bundleno = 5 (0x5), region = 85 }
 0x20e   :  { %874 = vsyncpa [#allocation3], 1 }
 0x20f   :  { %876 = vsyncpa [#allocation3 + $0x1], 1 }
 0x210   :  { %877 = vsyncpa [#allocation4], 1 }
 0x211   :  { %879 = vsyncpa [#allocation4 + $0x1], 1 }

</bundles_post_ra>
